<compile_context>
chip_gen: v5e
topology: v5e:2x2
jax: 0.10.0
libtpu: 0.0.40
codegen_flags: <defaults>
</compile_context>

<pallas_src>
import jax
import jax.numpy as jnp
from jax.experimental import pallas as pl
from jax.experimental.pallas import tpu as pltpu

_CHUNK = 2048  # lanes per inner compute chunk on the VPU path


def _round_up(x, m):
    return ((x + m - 1) // m) * m


def _sublane_tile(itemsize):
    return {4: 8, 2: 16, 1: 32}.get(itemsize, 8)


def _largest_divisor_leq(n, cap):
    cap = max(1, min(n, cap))
    for d in range(cap, 0, -1):
        if n % d == 0:
            return d
    return 1


def _pick_tiling(n, c_in, c_out, hw, itemsize, max_ts=None):
    """Choose (batch block nb, spatial tile ts, vmem_limit_bytes)."""
    sub = _sublane_tile(itemsize)
    c_in_p = _round_up(c_in, sub)    # physical sublane-padded channel counts
    c_out_p = _round_up(c_out, sub)

    try:  # generation-aware per-TC VMEM capacity
        vmem_cap = int(pltpu.get_tpu_info().vmem_capacity_bytes)
    except Exception:
        vmem_cap = 64 * 1024 * 1024  # v7x per-TC; conservative fallback

    buf_budget = int(0.55 * vmem_cap)          # double-buffered in+out blocks
    target_step_bytes = 4 * 1024 * 1024        # in+out HBM traffic per step

    # largest spatial tile the (padded, double-buffered) VMEM budget allows
    max_ts_vmem = max(128, buf_budget // (2 * (c_in_p + c_out_p) * itemsize))
    # spatial tile that hits the per-step traffic target
    ts_target = max(128, target_step_bytes // ((c_in + c_out) * itemsize))

    ts = min(hw, ts_target, max_ts_vmem)
    if max_ts is not None:
        ts = min(ts, max_ts)
    if ts >= hw:
        ts = hw                                 # full-dim block (any size ok)
    elif ts >= _CHUNK:
        ts = (ts // _CHUNK) * _CHUNK            # chunk- and lane-aligned
    else:
        ts = max(128, (ts // 128) * 128)        # lane-aligned

    # batch-block small feature maps to amortize per-step pipeline overhead
    nb = 1
    if ts == hw and n > 1:
        per_image = hw * (c_in + c_out) * itemsize
        per_image_pad = hw * (c_in_p + c_out_p) * itemsize
        nb_cap = max(1, min(n,
                            target_step_bytes // max(per_image, 1),
                            buf_budget // max(2 * per_image_pad, 1)))
        nb = _largest_divisor_leq(n, nb_cap)
        # keep >= 2 parallel grid steps (megacore / dual-TC balance)
        if nb == n and pl.cdiv(hw, ts) == 1:
            nb = _largest_divisor_leq(n, max(1, n // 2))

    vmem_limit = int(min(vmem_cap, buf_budget + 8 * 1024 * 1024))
    return nb, ts, vmem_limit


def _make_mxu_kernel(nb):
    def kernel(x_ref, w_ref, o_ref):
        # x_ref: (nb, C_in, TS), w_ref: (C_out, C_in), o_ref: (nb, C_out, TS)
        w = w_ref[...]
        for b in range(nb):  # nb is a small compile-time constant
            o_ref[b] = jnp.dot(
                w, x_ref[b], preferred_element_type=jnp.float32
            ).astype(o_ref.dtype)
    return kernel


def _make_vpu_kernel(nb, c_in, ts):
    use_loop = (ts % _CHUNK == 0) and (ts > _CHUNK)
    n_chunks = ts // _CHUNK if use_loop else 1

    def _accumulate(x, wcols):
        # x: (nb, c_in, cs) f32; wcols[c]: (c_out, 1) f32 (pre-splat, hoisted)
        acc = x[:, 0:1, :] * wcols[0]
        for c in range(1, c_in):
            acc = acc + x[:, c:c + 1, :] * wcols[c]
        return acc  # (nb, c_out, cs)

    def kernel(x_ref, w_ref, o_ref):
        # Hoist weight load + column splats out of the accumulate chain.
        w = w_ref[...].astype(jnp.float32)              # (c_out, c_in), tiny
        wcols = [w[:, c:c + 1] for c in range(c_in)]

        if use_loop:
            # Strip-mine the big tile: bounded vreg/VMEM intermediate pressure.
            def body(i, carry):
                s = pl.multiple_of(i * _CHUNK, _CHUNK)
                x = x_ref[:, :, pl.ds(s, _CHUNK)].astype(jnp.float32)
                o_ref[:, :, pl.ds(s, _CHUNK)] = _accumulate(x, wcols).astype(
                    o_ref.dtype)
                return carry
            jax.lax.fori_loop(0, n_chunks, body, 0)
        else:
            x = x_ref[...].astype(jnp.float32)
            o_ref[...] = _accumulate(x, wcols).astype(o_ref.dtype)

    return kernel


def conv1x1_forward(x, weight, stride=1, max_spatial_tile=None):
    """1x1 conv, no bias, NCHW in / NCHW out.

    x:      (N, C_in, H, W)
    weight: (C_out, C_in, 1, 1)  -- PyTorch Conv2d layout
    """
    n, c_in, h, w = x.shape
    c_out = weight.shape[0]
    itemsize = jnp.dtype(x.dtype).itemsize

    # stride for a 1x1 conv is pure spatial subsampling (glue, not hot path)
    # TODO(synk): fuse the subsample into the kernel to avoid the extra HBM pass.
    if stride != 1:
        x = x[:, :, ::stride, ::stride]
    hp, wp = x.shape[2], x.shape[3]
    hw = hp * wp

    x3 = x.reshape(n, c_in, hw)          # free reshape (stays NCHW-contiguous)
    w2 = weight.reshape(c_out, c_in)     # (C_out, C_in), no transpose needed

    nb, ts, vmem_limit = _pick_tiling(n, c_in, c_out, hw, itemsize,
                                      max_ts=max_spatial_tile)
    grid = (pl.cdiv(n, nb), pl.cdiv(hw, ts))

    # MXU unless channels are truly tiny; earlier cutover for narrow dtypes and
    # for long serial chains (large C_in) that would saturate the VPU.
    eff = (c_in * c_out) / (c_in + c_out)
    use_mxu = eff >= (8 if itemsize >= 4 else 4) or c_in >= 32
    kernel = (_make_mxu_kernel(nb) if use_mxu
              else _make_vpu_kernel(nb, c_in, ts))

    cost = pl.CostEstimate(
        flops=2 * n * hw * c_in * c_out,
        bytes_accessed=n * hw * (c_in + c_out) * itemsize
        + c_in * c_out * itemsize,
        transcendentals=0,
    )

    out3 = pl.pallas_call(
        kernel,
        out_shape=jax.ShapeDtypeStruct((n, c_out, hw), x.dtype),
        grid_spec=pltpu.PrefetchScalarGridSpec(
            num_scalar_prefetch=0,
            grid=grid,
            in_specs=[
                # activation tile: (nb, C_in, TS), lane axis = spatial
                pl.BlockSpec((nb, c_in, ts), lambda ni, si: (ni, 0, si)),
                # weight: constant index_map -> fetched once, stays resident
                pl.BlockSpec((c_out, c_in), lambda ni, si: (0, 0)),
            ],
            # lane-dense output: last dim is the spatial tile, not C_out
            out_specs=pl.BlockSpec((nb, c_out, ts), lambda ni, si: (ni, 0, si)),
        ),
        compiler_params=pltpu.CompilerParams(
            dimension_semantics=("parallel", "parallel"),
            vmem_limit_bytes=vmem_limit,
        ),
        cost_estimate=cost,
    )(x3, w2)

    return out3.reshape(n, c_out, hp, wp)  # free reshape back to NCHW


if __name__ == "__main__":
    key = jax.random.PRNGKey(0)
    kx, kw = jax.random.split(key)

    # module: conv1x1(planes=4, out_planes=8); input NCHW
    N, C_IN, H, W = 2, 4, 16, 16
    C_OUT = 8

    x = jax.random.normal(kx, (N, C_IN, H, W), dtype=jnp.float32)
    weight = jax.random.normal(kw, (C_OUT, C_IN, 1, 1), dtype=jnp.float32) * 0.1
    w2 = weight.reshape(C_OUT, C_IN)

    # stride = 1
    y1 = jax.block_until_ready(conv1x1_forward(x, weight, stride=1))
    y1_ref = jnp.einsum("nchw,oc->nohw", x, w2)
    assert y1.shape == y1_ref.shape, (y1.shape, y1_ref.shape)
    assert jnp.allclose(y1, y1_ref, atol=1e-5, rtol=1e-5)

    # stride = 2 (spatial subsampling path)
    y2 = jax.block_until_ready(conv1x1_forward(x, weight, stride=2))
    y2_ref = jnp.einsum("nchw,oc->nohw", x[:, :, ::2, ::2], w2)
    assert y2.shape == y2_ref.shape, (y2.shape, y2_ref.shape)
    assert jnp.allclose(y2, y2_ref, atol=1e-5, rtol=1e-5)

    # ragged spatial tail: H*W = 320, forced 128-lane tiles -> masked tail block
    xr = jax.random.normal(kx, (1, C_IN, 16, 20), dtype=jnp.float32)
    yr = jax.block_until_ready(conv1x1_forward(xr, weight, max_spatial_tile=128))
    yr_ref = jnp.einsum("nchw,oc->nohw", xr, w2)
    assert jnp.allclose(yr, yr_ref, atol=1e-5, rtol=1e-5)

    # bf16 path (VPU branch with f32 accumulation)
    xb = x.astype(jnp.bfloat16)
    wb = weight.astype(jnp.bfloat16)
    yb = jax.block_until_ready(conv1x1_forward(xb, wb))
    yb_ref = jnp.einsum("nchw,oc->nohw", xb.astype(jnp.float32),
                        wb.reshape(C_OUT, C_IN).astype(jnp.float32))
    assert jnp.allclose(yb.astype(jnp.float32), yb_ref, atol=5e-2, rtol=5e-2)

    # larger channel counts -> MXU branch
    C2_IN, C2_OUT = 32, 64
    xm = jax.random.normal(kx, (2, C2_IN, 8, 8), dtype=jnp.float32)
    wm = jax.random.normal(kw, (C2_OUT, C2_IN, 1, 1), dtype=jnp.float32) * 0.05
    ym = jax.block_until_ready(conv1x1_forward(xm, wm))
    ym_ref = jnp.einsum("nchw,oc->nohw", xm, wm.reshape(C2_OUT, C2_IN))
    assert jnp.allclose(ym, ym_ref, atol=1e-4, rtol=1e-4)

    print("KERNEL_OK")
</pallas_src>

<mosaic_0001>
module attributes {stable_mosaic.version = 11 : i64} {
  func.func @kernel(%arg0: i32, %arg1: i32, %arg2: memref<1x4x256xf32, #tpu.memory_space<vmem>>, %arg3: memref<8x4xf32, #tpu.memory_space<vmem>>, %arg4: memref<1x8x256xf32, #tpu.memory_space<vmem>>) attributes {dimension_semantics = [#tpu.dimension_semantics<parallel>, #tpu.dimension_semantics<parallel>], iteration_bounds = array<i64: 2, 1>, scalar_prefetch = 0 : i64, scratch_operands = 0 : i64, tpu.core_type = #tpu.core_type<tc>, window_params = [{transform_indices = @transform_0, window_bounds = array<i64: 1, 4, 256>}, {pipeline_mode = #tpu.pipeline_mode<synchronous>, transform_indices = @transform_1, window_bounds = array<i64: 8, 4>}, {transform_indices = @transform_2, window_bounds = array<i64: 1, 8, 256>}]} {
    %c0 = arith.constant 0 : index
    %c0_0 = arith.constant 0 : index
    %0 = vector.load %arg3[%c0, %c0_0] : memref<8x4xf32, #tpu.memory_space<vmem>>, vector<8x4xf32>
    %1 = vector.extract_strided_slice %0 {offsets = [0, 0], sizes = [8, 1], strides = [1, 1]} : vector<8x4xf32> to vector<8x1xf32>
    %2 = vector.extract_strided_slice %0 {offsets = [0, 1], sizes = [8, 1], strides = [1, 1]} : vector<8x4xf32> to vector<8x1xf32>
    %3 = vector.extract_strided_slice %0 {offsets = [0, 2], sizes = [8, 1], strides = [1, 1]} : vector<8x4xf32> to vector<8x1xf32>
    %4 = vector.extract_strided_slice %0 {offsets = [0, 3], sizes = [8, 1], strides = [1, 1]} : vector<8x4xf32> to vector<8x1xf32>
    %c0_1 = arith.constant 0 : index
    %c0_2 = arith.constant 0 : index
    %c0_3 = arith.constant 0 : index
    %5 = vector.load %arg2[%c0_1, %c0_2, %c0_3] : memref<1x4x256xf32, #tpu.memory_space<vmem>>, vector<1x4x256xf32>
    %6 = vector.extract_strided_slice %5 {offsets = [0, 0, 0], sizes = [1, 1, 256], strides = [1, 1, 1]} : vector<1x4x256xf32> to vector<1x1x256xf32>
    %7 = vector.shape_cast %1 : vector<8x1xf32> to vector<1x8x1xf32>
    %8 = vector.broadcast %6 : vector<1x1x256xf32> to vector<1x8x256xf32>
    %9 = vector.broadcast %7 : vector<1x8x1xf32> to vector<1x8x256xf32>
    %10 = arith.mulf %8, %9 : vector<1x8x256xf32>
    %11 = vector.extract_strided_slice %5 {offsets = [0, 1, 0], sizes = [1, 1, 256], strides = [1, 1, 1]} : vector<1x4x256xf32> to vector<1x1x256xf32>
    %12 = vector.shape_cast %2 : vector<8x1xf32> to vector<1x8x1xf32>
    %13 = vector.broadcast %11 : vector<1x1x256xf32> to vector<1x8x256xf32>
    %14 = vector.broadcast %12 : vector<1x8x1xf32> to vector<1x8x256xf32>
    %15 = arith.mulf %13, %14 : vector<1x8x256xf32>
    %16 = arith.addf %10, %15 : vector<1x8x256xf32>
    %17 = vector.extract_strided_slice %5 {offsets = [0, 2, 0], sizes = [1, 1, 256], strides = [1, 1, 1]} : vector<1x4x256xf32> to vector<1x1x256xf32>
    %18 = vector.shape_cast %3 : vector<8x1xf32> to vector<1x8x1xf32>
    %19 = vector.broadcast %17 : vector<1x1x256xf32> to vector<1x8x256xf32>
    %20 = vector.broadcast %18 : vector<1x8x1xf32> to vector<1x8x256xf32>
    %21 = arith.mulf %19, %20 : vector<1x8x256xf32>
    %22 = arith.addf %16, %21 : vector<1x8x256xf32>
    %23 = vector.extract_strided_slice %5 {offsets = [0, 3, 0], sizes = [1, 1, 256], strides = [1, 1, 1]} : vector<1x4x256xf32> to vector<1x1x256xf32>
    %24 = vector.shape_cast %4 : vector<8x1xf32> to vector<1x8x1xf32>
    %25 = vector.broadcast %23 : vector<1x1x256xf32> to vector<1x8x256xf32>
    %26 = vector.broadcast %24 : vector<1x8x1xf32> to vector<1x8x256xf32>
    %27 = arith.mulf %25, %26 : vector<1x8x256xf32>
    %28 = arith.addf %22, %27 : vector<1x8x256xf32>
    %c0_4 = arith.constant 0 : index
    %c0_5 = arith.constant 0 : index
    %c0_6 = arith.constant 0 : index
    %29 = vector.load %arg4[%c0_4, %c0_5, %c0_6] : memref<1x8x256xf32, #tpu.memory_space<vmem>>, vector<1x8x256xf32>
    tpu.vector_store %arg4[%c0_4, %c0_5, %c0_6], %28 {strides = array<i32>} : memref<1x8x256xf32, #tpu.memory_space<vmem>>, vector<1x8x256xf32>,
    return
  }
  func.func @transform_0(%arg0: i32, %arg1: i32) -> (i32, i32, i32) {
    %c0_i32 = arith.constant 0 : i32
    %c0_i32_0 = arith.constant 0 : i32
    return %arg0, %c0_i32, %arg1 : i32, i32, i32
  }
  func.func @transform_1(%arg0: i32, %arg1: i32) -> (i32, i32) {
    %c0_i32 = arith.constant 0 : i32
    %c0_i32_0 = arith.constant 0 : i32
    %c0_i32_1 = arith.constant 0 : i32
    return %c0_i32, %c0_i32_0 : i32, i32
  }
  func.func @transform_2(%arg0: i32, %arg1: i32) -> (i32, i32, i32) {
    %c0_i32 = arith.constant 0 : i32
    %c0_i32_0 = arith.constant 0 : i32
    return %arg0, %c0_i32, %arg1 : i32, i32, i32
  }
}

</mosaic_0001>

<bundles_post_ra>
// kernel: tpu_custom_call.1
= control target key start
LH: loop header
LB: loop body
LE: loop exit
PB: predicated region body
PF: predicated region fallthrough
CT: control target
= control target key end

     0   :  { %7 = vsyncpa [#allocation3], 0  ;;  %s690_s0 = inlined_call_operand.hbm [shape: f32[2,4,256], index: 0, kind: input, shape index: {}]   ;;  %s691_s1 = inlined_call_operand.vmem [shape: f32[8,4], index: 1, kind: input, shape index: {}]   ;;  %s692_s2 = inlined_call_operand.hbm [shape: f32[2,8,256], index: 2, kind: output, shape index: {}]  }
   0x1   :  { %9 = vsyncpa [#allocation3 + $0x1], 0 }
   0x2   :  { %10 = vsyncpa [#allocation4], 0 }
   0x3   :  { %12 = vsyncpa [#allocation4 + $0x1], 0  ;;  %s566_s9 = smov 0   ;;  %s568_s10 = smov 0  }
   0x4   :  { %s570_s11 = smov 0   ;;  %s572_s12 = smov 0  }
   0x5   :  { %s574_s13 = smov 0   ;;  %s576_s14 = smov 0  }
   0x6 LB: > { %s345_s15 = sadd.s32 4294967295, %s545_s14   ;;  %s346_s16 = sadd.s32 4294967294, %s545_s14   ;;  %s545_s14 = sphi %s576_s14, %s18_s14   ;;  %s541_s13 = sphi %s574_s13, %s701_s13   ;;  %s537_s12 = sphi %s572_s12, %s700_s12   ;;  %s533_s11 = sphi %s570_s11, %s699_s11   ;;  %s529_s10 = sphi %s568_s10, %s698_s10   ;;  %s525_s9 = sphi %s566_s9, %s697_s9  }
   0x7   : > { %s30_s17 = sadd.s32 1, %s541_s13  ;;  %s39_s18 = sadd.s32 1, %s533_s11 }
   0x8   : > { %p32_p0 = scmp.ge.s32.totalorder %s30_s17, 2  ;;  %p46_p1 = scmp.ne.s32.totalorder %s533_s11, %s529_s10 }
   0x9   : > { %p47_p2 = scmp.eq.s32.totalorder %s545_s14, 0  ;;  %p52_p3 = scmp.ne.s32.totalorder %s529_s10, %s525_s9 }
   0xa   : > { %s703_s17 = smov (%p32_p0, %s30_s17), 0  ;;  %p53_p5 = scmp.eq.s32.totalorder %s345_s15, 0 }
   0xb   : > { %p607_p4 = por %p47_p2, %p46_p1  ;;  %s34_s20 = ssub.s32 %s541_s13, %s703_s17 }
   0xc   : > { %p99_p6 = scmp.eq.s32.totalorder %s345_s15, 1  ;;  %p37_p7 = scmp.eq.s32.totalorder %s34_s20, 0 }
   0xd   : > { %p613_p8 = por %p53_p5, %p52_p3  ;;  %p105_p10 = scmp.eq.s32.totalorder %s346_s16, 1 }
   0xe   : > { %p617_p9 = por %p99_p6, %p46_p1  ;;  %p348_p12 = scmp.ge.s32.totalorder %s545_s14, 2 }
   0xf   : > { %s622_s23 = scalar_select %p37_p7, %s533_s11, %s39_s18  }
  0x10   : > { %p624_p11 = por %p105_p10, %p52_p3  ;;  %p374_p13 = scmp.lt.s32.totalorder %s545_s14, 2 }
  0x11   : > { %s128_s25 = sand.u32 1, %s533_s11   ;;  %s360_s27 = sshll.u32 %s541_s13, 3 }
  0x12   : > { %s349_s26 = sshll.u32 %s128_s25, 3  ;;  %s139_s30 = scalar_lea.hbm %s690_s0, %s360_s27 }
  0x13   : > { %s132_s3 = scalar_lea.vmem [#allocation2], %s349_s26  ;;  %s141_s5 = sshll.u32 %s139_s30, 4  ;;  %s142_s5 = int_to_ptr.hbm [resolvable:$true] %s141_s5 }
  0x14   : > { %s143_s4 = sshll.u32 %s132_s3, 4  ;;  %p367_p0 = pnand %p374_p13, %p607_p4  ;;  %s144_s4 = int_to_ptr.vmem [resolvable:$true] %s143_s4 }
  0x15   : > { %p352_p1 = scmp.ge.s32.totalorder %s545_s14, 1  ;;  %p148_p2 = scmp.lt.s32.totalorder %s545_s14, 3 }
  0x16   : > { %s129_s6 = scalar_lea.sflag [#allocation3], %s128_s25 }
  0x17   : > { %369 = dma.hbm_to_vmem [thread:$0]  (!%p367_p0), %s142_s5, 128, %s144_s4, %s129_s6  }
  0x18   : > { %p149_p3 = pnand %p352_p1, %p148_p2 }
  0x19   : > { %s640_s7 = sand.u32 (!%p149_p3), 1, %s529_s10  }
  0x1a   : > { %152 = sbr.rel (%p149_p3) target bundleno = 170 (0xaa), region = 28  ;;  %s353_s8 = sshll.u32 (!%p149_p3), %s640_s7, 3 }
  0x1b   : > { %s155_s15 = scalar_lea.sflag (!%p149_p3), [#allocation3], %s640_s7  ;;  %s158_s16 = scalar_lea.vmem (!%p149_p3), [#allocation2], %s353_s8 }
  0x1f   : > { %516 = dma.done.wait (%p613_p8), %s155_s15, 128  }
  0x20   : > { %518 = vsyncadd (%p613_p8), %s155_s15, 4294967168  ;;  %v547_v0 = vmov 0   ;;  %v548_v1 = vmov 2   ;;  %v182_v2 = vld [vmem:[%s691_s1] sm:$0xff]  ;;  %v549_v3 = vmov 1   ;;  %v550_v4 = vmov 3  }
  0x21   : > { %428 = vset.pattern.permute.xlu0 %v547_v0  ;;  %430 = vset.pattern.permute.xlu1 %v548_v1  ;;  %v183_v5 = vld [vmem:[%s158_s16] sm:$0xff]  ;;  %s354_s20 = sshll.u32 %s640_s7, 4  ;;  %s361_s21 = sshll.u32 %s537_s12, 4 }
  0x22   : > { %193 = vperm.xlu0 %428, %v182_v2   ;;  %219 = vperm.xlu1 %430, %v182_v2   ;;  %v185_v8 = vperm.slane %v183_v5, 0  ;;  %v186_v9 = vperm.slane %v183_v5, 4  ;;  %v198_v10 = vperm.slane %v183_v5, 1  ;;  %v199_v11 = vperm.slane %v183_v5, 5  ;;  %s256_s27 = scalar_lea.hbm %s692_s2, %s361_s21  ;;  %s179_s12 = scalar_lea.vmem [#allocation5], %s354_s20 }
  0x23   : > { %v212_v12 = vperm.slane %v183_v5, 2  ;;  %v213_v13 = vperm.slane %v183_v5, 6  ;;  %v226_v14 = vperm.slane %v183_v5, 3  ;;  %v227_v15 = vperm.slane %v183_v5, 7  ;;  %s258_s28 = sshll.u32 %s179_s12, 4  ;;  %s260_s29 = sshll.u32 %s256_s27, 4  ;;  %s259_s28 = int_to_ptr.vmem [resolvable:$true] %s258_s28  ;;  %s261_s29 = int_to_ptr.hbm [resolvable:$true] %s260_s29 }
  0x24   : > { %v189_v16 = vperm.slane %v185_v8, 0  ;;  %v190_v17 = vperm.slane %v186_v9, 0  ;;  %v202_v18 = vperm.slane %v198_v10, 1  ;;  %v203_v19 = vperm.slane %v199_v11, 1  ;;  %s243_s30 = scalar_lea.sflag [#allocation4], %s640_s7  ;;  %s477_s3 = sshra.s32 %s261_s29, 4  ;;  %s478_s3 = int_to_ptr.hbm [resolvable:$true] %s477_s3 }
  0x25   : > { %v216_v20 = vperm.slane %v212_v12, 2  ;;  %v217_v21 = vperm.slane %v213_v13, 2  ;;  %v230_v22 = vperm.slane %v226_v14, 3  ;;  %v231_v23 = vperm.slane %v227_v15, 3  ;;  %s479_s4 = scalar_lea.hbm %s478_s3, 16  ;;  %s483_s8 = scalar_lea.hbm %s692_s2, 32 }
  0x26   : > { %p480_p4 = scmp.ne.s32.totalorder %s478_s3, %s479_s4  ;;  %p484_p7 = scmp.lt.s32.totalorder %s478_s3, %s692_s2 }
  0x27   : > { %p485_p8 = scmp.lt.s32.totalorder %s483_s8, %s479_s4 }
  0x28   : > { %p481_p5 = pnand %p480_p4, %p617_p9 }
  0x29   : > { %p486_p10 = por %p485_p8, %p484_p7 }
  0x2a   : > { %429 = vset.pattern.permute.xlu0 %v549_v3  ;;  %431 = vset.pattern.permute.xlu1 %v550_v4  ;;  %p482_p6 = pneg %p481_p5 }
  0x2b   : > { %205 = vperm.xlu0 %429, %v182_v2   ;;  %233 = vperm.xlu1 %431, %v182_v2  }
  0x2c   : > { %p487_p13 = pnand %p486_p10, %p482_p6 }
  0x33   : > { %432 = vset.pattern.permute.xlu0 %v550_v4 }
  0x94   : > { %v194_v6 = vpop.permute.xlu0 %193  ;;  %v220_v7 = vpop.permute.xlu1 %219 }
  0x95   : > { %v196_v26 = vmul.f32 %v194_v6, %v189_v16  ;;  %v197_v27 = vmul.f32 %v194_v6, %v190_v17  ;;  %v222_v30 = vmul.f32 %v220_v7, %v216_v20  ;;  %v223_v31 = vmul.f32 %v220_v7, %v217_v21 }
  0x9d   : > { %v206_v24 = vpop.permute.xlu0 %205  ;;  %v234_v25 = vpop.permute.xlu1 %233 }
  0x9e   : > { %v208_v28 = vmul.f32 %v206_v24, %v202_v18  ;;  %v209_v29 = vmul.f32 %v206_v24, %v203_v19  ;;  %v236_v34 = vmul.f32 %v234_v25, %v230_v22  ;;  %v237_v35 = vmul.f32 %v234_v25, %v231_v23 }
  0xa0   : > { %v210_v32 = vadd.f32 %v208_v28, %v196_v26  ;;  %v211_v33 = vadd.f32 %v209_v29, %v197_v27 }
  0xa2   : > { %v224_v36 = vadd.f32 %v222_v30, %v210_v32  ;;  %v225_v37 = vadd.f32 %v223_v31, %v211_v33 }
  0xa4   : > { %v238_v38 = vadd.f32 %v236_v34, %v224_v36  ;;  %v239_v39 = vadd.f32 %v237_v35, %v225_v37 }
  0xa6   : > { %240 = vst [vmem:[%s179_s12] sm:$0xff] %v238_v38 }
  0xa7   : > { %241 = vst [vmem:[%s179_s12 + $0x8] sm:$0xff] %v239_v39 }
  0xa8   : > { %490 = shalt.err (!%p487_p13)
}
  0xa9   : > { %364 = dma.vmem_to_hbm [thread:$0]  (%p617_p9), %s259_s28, 256, %s261_s29, %s243_s30  }
  0xaa PF: > { %s272_s7 = sand.u32 1, %s525_s9   ;;  %p371_p0 = pnand %p348_p12, %p624_p11 }
  0xab   : > { %s273_s18 = scalar_lea.sflag [#allocation4], %s272_s7 }
  0xac   : > { %p372_p1 = pneg %p371_p0 }
  0xae   : > { %520 = dma.done.wait (%p372_p1), %s273_s18, 256  }
  0xaf   : > { %522 = vsyncadd (%p372_p1), %s273_s18, 4294967040  ;;  %s18_s14 = sadd.s32 1, %s545_s14   ;;  %s697_s9 = smov %s529_s10 }
  0xb0   : > { %p15_p2 = scmp.ge.s32.totalorder %s18_s14, 4   ;;  %s698_s10 = smov %s533_s11 }
  0xb1   : > { %s699_s11 = smov %s622_s23  ;;  %s700_s12 = smov %s541_s13 }
  0xb2   : > { %s701_s13 = smov %s703_s17  ;;  %17 = sbr.rel (!%p15_p2) target bundleno = 6 (0x6), region = 73 }
  0xb7   :  { %279 = vsyncpa [#allocation3], 1 }
  0xb8   :  { %281 = vsyncpa [#allocation3 + $0x1], 1 }
  0xb9   :  { %282 = vsyncpa [#allocation4], 1 }
  0xba   :  { %284 = vsyncpa [#allocation4 + $0x1], 1 }

</bundles_post_ra>
